<compile_context>
chip_gen: v5e
topology: v5e:2x2
jax: 0.10.0
libtpu: 0.0.40
codegen_flags: <defaults>
</compile_context>

<pallas_src>
import functools

import jax
import jax.numpy as jnp
from jax.experimental import pallas as pl
from jax.experimental.pallas import tpu as pltpu


REPARAM_NOISE = 1e-6


def _cdiv(a, b):
    return -(-a // b)


def _round_up(x, m):
    return ((x + m - 1) // m) * m


def _pick_batch_tile(B, tile_b):
    """Pick the batch tile:
       * >= 2 grid steps once B > 16 so v7x megacore sharding has work for both
         TensorCores (no-op on single-TC v5e/v6e),
       * tile ~ B / n_tiles rounded to the bf16 sublane pack, so padding stays
         small for batch sizes just above a tile boundary."""
    min_tiles = 2 if B > 16 else 1
    n_tiles = max(min_tiles, _cdiv(B, tile_b))
    pack = 16 if B >= 16 else 8           # bf16 vregs pack 16 sublanes
    return _round_up(_cdiv(B, n_tiles), pack)


def _actor_kernel(x_ref, w1_ref, b1_ref, w2_ref, b2_ref,
                  wh_ref, bh_ref, lo_ref, hi_ref, out_ref):
    # fc1 + ReLU  (bf16 MXU operands, f32 accumulation / elementwise)
    x = x_ref[...].astype(jnp.bfloat16)
    h1 = jnp.dot(x, w1_ref[...], preferred_element_type=jnp.float32) + b1_ref[...]
    h1 = jnp.maximum(h1, 0.0).astype(jnp.bfloat16)

    # fc2 + ReLU
    h2 = jnp.dot(h1, w2_ref[...], preferred_element_type=jnp.float32) + b2_ref[...]
    h2 = jnp.maximum(h2, 0.0).astype(jnp.bfloat16)

    # fused mu|sigma head (lane-padded to a 128-multiple output width)
    head = jnp.dot(h2, wh_ref[...], preferred_element_type=jnp.float32) + bh_ref[...]

    # sigma-lane clamp via precomputed per-lane lo/hi vectors
    # (mu / pad lanes hold -inf / +inf so max/min are no-ops there).
    head = jnp.minimum(jnp.maximum(head, lo_ref[...]), hi_ref[...])

    # f32 math above; cast only at the final (lane-dense) store.
    out_ref[...] = head.astype(out_ref.dtype)


@functools.partial(jax.jit, static_argnames=("n_actions", "tile_b"))
def actor_forward(state, w1, b1, w2, b2, w_head, b_head, clip_lo, clip_hi,
                  *, n_actions, tile_b=512):
    """Pallas-backed ActorNetwork.forward.  Returns (mu, sigma) as float32."""
    B, D = state.shape
    fc1 = w1.shape[1]
    fc2 = w2.shape[1]
    h_pad = w_head.shape[1]               # fused head width, padded to >=128 lanes

    tb = _pick_batch_tile(B, tile_b)
    b_padded = _round_up(B, tb)
    if b_padded != B:
        state = jnp.pad(state, ((0, b_padded - B), (0, 0)))
    grid = (b_padded // tb,)

    # Grid-invariant operands: constant index_map -> single buffer is enough.
    resident = dict(pipeline_mode=pl.Buffered(1))

    out = pl.pallas_call(
        _actor_kernel,
        out_shape=jax.ShapeDtypeStruct((b_padded, h_pad), jnp.bfloat16),
        grid=grid,
        in_specs=[
            pl.BlockSpec((tb, D), lambda i: (i, 0)),                   # state tile
            pl.BlockSpec((D, fc1), lambda i: (0, 0), **resident),      # W1
            pl.BlockSpec((1, fc1), lambda i: (0, 0), **resident),      # b1
            pl.BlockSpec((fc1, fc2), lambda i: (0, 0), **resident),    # W2
            pl.BlockSpec((1, fc2), lambda i: (0, 0), **resident),      # b2
            pl.BlockSpec((fc2, h_pad), lambda i: (0, 0), **resident),  # fused head W
            pl.BlockSpec((1, h_pad), lambda i: (0, 0), **resident),    # fused head b
            pl.BlockSpec((1, h_pad), lambda i: (0, 0), **resident),    # clamp lo
            pl.BlockSpec((1, h_pad), lambda i: (0, 0), **resident),    # clamp hi
        ],
        out_specs=pl.BlockSpec((tb, h_pad), lambda i: (i, 0)),
        compiler_params=pltpu.CompilerParams(
            dimension_semantics=("parallel",)),        # both TCs on v7x
    )(state, w1, b1, w2, b2, w_head, b_head, clip_lo, clip_hi)

    mu = out[:B, :n_actions].astype(jnp.float32)
    sigma = out[:B, n_actions:2 * n_actions].astype(jnp.float32)
    return mu, sigma


def init_params(key, input_dim, fc1_dims, fc2_dims, n_actions):
    """Deterministic init mimicking PyTorch nn.Linear (uniform +-1/sqrt(fan_in)).

    Weights stored as (in, out) bf16; biases as (1, out) f32.  The mu and sigma
    heads are fused + zero-padded to a lane-dense (>=128) width, and per-lane
    clamp vectors implement sigma's [1e-6, 1] clip in-kernel."""
    def linear(key, fan_in, fan_out):
        kw, kb = jax.random.split(key)
        bound = 1.0 / (fan_in ** 0.5)
        w = jax.random.uniform(kw, (fan_in, fan_out), jnp.float32, -bound, bound)
        b = jax.random.uniform(kb, (1, fan_out), jnp.float32, -bound, bound)
        return w, b

    k1, k2, k3, k4 = jax.random.split(key, 4)
    w1, b1 = linear(k1, input_dim, fc1_dims)
    w2, b2 = linear(k2, fc1_dims, fc2_dims)
    wmu, bmu = linear(k3, fc2_dims, n_actions)
    wsig, bsig = linear(k4, fc2_dims, n_actions)

    h_pad = max(128, _round_up(2 * n_actions, 128))
    w_head = jnp.zeros((fc2_dims, h_pad), jnp.float32)
    w_head = w_head.at[:, :n_actions].set(wmu)
    w_head = w_head.at[:, n_actions:2 * n_actions].set(wsig)
    b_head = jnp.zeros((1, h_pad), jnp.float32)
    b_head = b_head.at[:, :n_actions].set(bmu)
    b_head = b_head.at[:, n_actions:2 * n_actions].set(bsig)

    lane = jnp.arange(h_pad)
    is_sigma = (lane >= n_actions) & (lane < 2 * n_actions)
    clip_lo = jnp.where(is_sigma, REPARAM_NOISE, -jnp.inf).reshape(1, h_pad).astype(jnp.float32)
    clip_hi = jnp.where(is_sigma, 1.0, jnp.inf).reshape(1, h_pad).astype(jnp.float32)

    return (w1.astype(jnp.bfloat16), b1,
            w2.astype(jnp.bfloat16), b2,
            w_head.astype(jnp.bfloat16), b_head,
            clip_lo, clip_hi)


if __name__ == "__main__":
    # Small, forward-consistent shapes:
    #   batch=8, input_dims=(32,), fc1=fc2=256, n_actions=2
    B, INPUT_DIM, FC1, FC2, N_ACTIONS = 8, 32, 256, 256, 2

    key = jax.random.PRNGKey(0)
    k_state, k_params = jax.random.split(key)

    state = jax.random.normal(k_state, (B, INPUT_DIM), jnp.float32)
    params = init_params(k_params, INPUT_DIM, FC1, FC2, N_ACTIONS)

    mu, sigma = actor_forward(state, *params, n_actions=N_ACTIONS)
    jax.block_until_ready((mu, sigma))

    # Reference check against plain JAX using the same bf16-weight / f32-accum
    # math (kernel additionally rounds the stored output to bf16, so tolerances
    # allow ~2^-9 relative error).
    w1, b1, w2, b2, w_head, b_head, _, _ = params
    xb = state.astype(jnp.bfloat16)
    h1 = jnp.maximum(jnp.dot(xb, w1, preferred_element_type=jnp.float32) + b1, 0.0)
    h2 = jnp.maximum(
        jnp.dot(h1.astype(jnp.bfloat16), w2, preferred_element_type=jnp.float32) + b2, 0.0)
    head = jnp.dot(h2.astype(jnp.bfloat16), w_head,
                   preferred_element_type=jnp.float32) + b_head
    mu_ref = head[:, :N_ACTIONS]
    sigma_ref = jnp.clip(head[:, N_ACTIONS:2 * N_ACTIONS], REPARAM_NOISE, 1.0)

    assert mu.shape == (B, N_ACTIONS) and sigma.shape == (B, N_ACTIONS)
    assert jnp.allclose(mu, mu_ref, atol=1e-2, rtol=1e-2), "mu mismatch"
    assert jnp.allclose(sigma, sigma_ref, atol=1e-2, rtol=1e-2), "sigma mismatch"
    # bf16 rounding of the 1e-6 floor keeps sigma within one ulp of the clamp.
    assert bool(jnp.all(sigma >= REPARAM_NOISE * 0.99))
    assert bool(jnp.all(sigma <= 1.0))

    print("KERNEL_OK")
</pallas_src>

<mosaic_0001>
module attributes {stable_mosaic.version = 11 : i64} {
  func.func @_actor_kernel(%arg0: i32, %arg1: memref<8x32xf32, #tpu.memory_space<vmem>>, %arg2: memref<32x256xbf16, #tpu.memory_space<vmem>>, %arg3: memref<1x256xf32, #tpu.memory_space<vmem>>, %arg4: memref<256x256xbf16, #tpu.memory_space<vmem>>, %arg5: memref<1x256xf32, #tpu.memory_space<vmem>>, %arg6: memref<256x128xbf16, #tpu.memory_space<vmem>>, %arg7: memref<1x128xf32, #tpu.memory_space<vmem>>, %arg8: memref<1x128xf32, #tpu.memory_space<vmem>>, %arg9: memref<1x128xf32, #tpu.memory_space<vmem>>, %arg10: memref<8x128xbf16, #tpu.memory_space<vmem>>) attributes {dimension_semantics = [#tpu.dimension_semantics<parallel>], iteration_bounds = array<i64: 1>, scalar_prefetch = 0 : i64, scratch_operands = 0 : i64, tpu.core_type = #tpu.core_type<tc>, window_params = [{transform_indices = @transform_0, window_bounds = array<i64: 8, 32>}, {pipeline_mode = #tpu.pipeline_mode<synchronous>, transform_indices = @transform_1, window_bounds = array<i64: 32, 256>}, {pipeline_mode = #tpu.pipeline_mode<synchronous>, transform_indices = @transform_2, window_bounds = array<i64: 1, 256>}, {pipeline_mode = #tpu.pipeline_mode<synchronous>, transform_indices = @transform_3, window_bounds = array<i64: 256, 256>}, {pipeline_mode = #tpu.pipeline_mode<synchronous>, transform_indices = @transform_4, window_bounds = array<i64: 1, 256>}, {pipeline_mode = #tpu.pipeline_mode<synchronous>, transform_indices = @transform_5, window_bounds = array<i64: 256, 128>}, {pipeline_mode = #tpu.pipeline_mode<synchronous>, transform_indices = @transform_6, window_bounds = array<i64: 1, 128>}, {pipeline_mode = #tpu.pipeline_mode<synchronous>, transform_indices = @transform_7, window_bounds = array<i64: 1, 128>}, {pipeline_mode = #tpu.pipeline_mode<synchronous>, transform_indices = @transform_8, window_bounds = array<i64: 1, 128>}, {transform_indices = @transform_9, window_bounds = array<i64: 8, 128>}]} {
    %c0 = arith.constant 0 : index
    %c0_0 = arith.constant 0 : index
    %0 = vector.load %arg1[%c0, %c0_0] : memref<8x32xf32, #tpu.memory_space<vmem>>, vector<8x32xf32>
    %1 = arith.truncf %0 : vector<8x32xf32> to vector<8x32xbf16>
    %c0_1 = arith.constant 0 : index
    %c0_2 = arith.constant 0 : index
    %2 = vector.load %arg2[%c0_1, %c0_2] : memref<32x256xbf16, #tpu.memory_space<vmem>>, vector<32x256xbf16>
    %cst = arith.constant dense<0.000000e+00> : vector<8x256xf32>
    %3 = tpu.matmul %1, %2, %cst {dimension_numbers = #tpu.dot_dimension_numbers<[1], [0], [0], [1], [0, 0, 1, 1], [], []>} : vector<8x32xbf16>, vector<32x256xbf16>, vector<8x256xf32> -> vector<8x256xf32>
    %c0_3 = arith.constant 0 : index
    %c0_4 = arith.constant 0 : index
    %4 = vector.load %arg3[%c0_3, %c0_4] : memref<1x256xf32, #tpu.memory_space<vmem>>, vector<1x256xf32>
    %5 = vector.broadcast %4 : vector<1x256xf32> to vector<8x256xf32>
    %6 = arith.addf %3, %5 : vector<8x256xf32>
    %cst_5 = arith.constant 0.000000e+00 : f32
    %7 = vector.broadcast %cst_5 : f32 to vector<8x256xf32>
    %8 = arith.maximumf %6, %7 : vector<8x256xf32>
    %9 = arith.truncf %8 : vector<8x256xf32> to vector<8x256xbf16>
    %c0_6 = arith.constant 0 : index
    %c0_7 = arith.constant 0 : index
    %10 = vector.load %arg4[%c0_6, %c0_7] : memref<256x256xbf16, #tpu.memory_space<vmem>>, vector<256x256xbf16>
    %cst_8 = arith.constant dense<0.000000e+00> : vector<8x256xf32>
    %11 = tpu.matmul %9, %10, %cst_8 {dimension_numbers = #tpu.dot_dimension_numbers<[1], [0], [0], [1], [0, 0, 1, 1], [], []>} : vector<8x256xbf16>, vector<256x256xbf16>, vector<8x256xf32> -> vector<8x256xf32>
    %c0_9 = arith.constant 0 : index
    %c0_10 = arith.constant 0 : index
    %12 = vector.load %arg5[%c0_9, %c0_10] : memref<1x256xf32, #tpu.memory_space<vmem>>, vector<1x256xf32>
    %13 = vector.broadcast %12 : vector<1x256xf32> to vector<8x256xf32>
    %14 = arith.addf %11, %13 : vector<8x256xf32>
    %cst_11 = arith.constant 0.000000e+00 : f32
    %15 = vector.broadcast %cst_11 : f32 to vector<8x256xf32>
    %16 = arith.maximumf %14, %15 : vector<8x256xf32>
    %17 = arith.truncf %16 : vector<8x256xf32> to vector<8x256xbf16>
    %c0_12 = arith.constant 0 : index
    %c0_13 = arith.constant 0 : index
    %18 = vector.load %arg6[%c0_12, %c0_13] : memref<256x128xbf16, #tpu.memory_space<vmem>>, vector<256x128xbf16>
    %cst_14 = arith.constant dense<0.000000e+00> : vector<8x128xf32>
    %19 = tpu.matmul %17, %18, %cst_14 {dimension_numbers = #tpu.dot_dimension_numbers<[1], [0], [0], [1], [0, 0, 1, 1], [], []>} : vector<8x256xbf16>, vector<256x128xbf16>, vector<8x128xf32> -> vector<8x128xf32>
    %c0_15 = arith.constant 0 : index
    %c0_16 = arith.constant 0 : index
    %20 = vector.load %arg7[%c0_15, %c0_16] : memref<1x128xf32, #tpu.memory_space<vmem>>, vector<1x128xf32>
    %21 = vector.broadcast %20 : vector<1x128xf32> to vector<8x128xf32>
    %22 = arith.addf %19, %21 : vector<8x128xf32>
    %c0_17 = arith.constant 0 : index
    %c0_18 = arith.constant 0 : index
    %23 = vector.load %arg8[%c0_17, %c0_18] : memref<1x128xf32, #tpu.memory_space<vmem>>, vector<1x128xf32>
    %24 = vector.broadcast %23 : vector<1x128xf32> to vector<8x128xf32>
    %25 = arith.maximumf %22, %24 : vector<8x128xf32>
    %c0_19 = arith.constant 0 : index
    %c0_20 = arith.constant 0 : index
    %26 = vector.load %arg9[%c0_19, %c0_20] : memref<1x128xf32, #tpu.memory_space<vmem>>, vector<1x128xf32>
    %27 = vector.broadcast %26 : vector<1x128xf32> to vector<8x128xf32>
    %28 = arith.minimumf %25, %27 : vector<8x128xf32>
    %29 = arith.truncf %28 : vector<8x128xf32> to vector<8x128xbf16>
    %c0_21 = arith.constant 0 : index
    %c0_22 = arith.constant 0 : index
    %30 = vector.load %arg10[%c0_21, %c0_22] : memref<8x128xbf16, #tpu.memory_space<vmem>>, vector<8x128xbf16>
    tpu.vector_store %arg10[%c0_21, %c0_22], %29 {strides = array<i32>} : memref<8x128xbf16, #tpu.memory_space<vmem>>, vector<8x128xbf16>,
    return
  }
  func.func @transform_0(%arg0: i32) -> (i32, i32) {
    %c0_i32 = arith.constant 0 : i32
    %c0_i32_0 = arith.constant 0 : i32
    return %arg0, %c0_i32 : i32, i32
  }
  func.func @transform_1(%arg0: i32) -> (i32, i32) {
    %c0_i32 = arith.constant 0 : i32
    %c0_i32_0 = arith.constant 0 : i32
    %c0_i32_1 = arith.constant 0 : i32
    return %c0_i32, %c0_i32_0 : i32, i32
  }
  func.func @transform_2(%arg0: i32) -> (i32, i32) {
    %c0_i32 = arith.constant 0 : i32
    %c0_i32_0 = arith.constant 0 : i32
    %c0_i32_1 = arith.constant 0 : i32
    return %c0_i32, %c0_i32_0 : i32, i32
  }
  func.func @transform_3(%arg0: i32) -> (i32, i32) {
    %c0_i32 = arith.constant 0 : i32
    %c0_i32_0 = arith.constant 0 : i32
    %c0_i32_1 = arith.constant 0 : i32
    return %c0_i32, %c0_i32_0 : i32, i32
  }
  func.func @transform_4(%arg0: i32) -> (i32, i32) {
    %c0_i32 = arith.constant 0 : i32
    %c0_i32_0 = arith.constant 0 : i32
    %c0_i32_1 = arith.constant 0 : i32
    return %c0_i32, %c0_i32_0 : i32, i32
  }
  func.func @transform_5(%arg0: i32) -> (i32, i32) {
    %c0_i32 = arith.constant 0 : i32
    %c0_i32_0 = arith.constant 0 : i32
    %c0_i32_1 = arith.constant 0 : i32
    return %c0_i32, %c0_i32_0 : i32, i32
  }
  func.func @transform_6(%arg0: i32) -> (i32, i32) {
    %c0_i32 = arith.constant 0 : i32
    %c0_i32_0 = arith.constant 0 : i32
    %c0_i32_1 = arith.constant 0 : i32
    return %c0_i32, %c0_i32_0 : i32, i32
  }
  func.func @transform_7(%arg0: i32) -> (i32, i32) {
    %c0_i32 = arith.constant 0 : i32
    %c0_i32_0 = arith.constant 0 : i32
    %c0_i32_1 = arith.constant 0 : i32
    return %c0_i32, %c0_i32_0 : i32, i32
  }
  func.func @transform_8(%arg0: i32) -> (i32, i32) {
    %c0_i32 = arith.constant 0 : i32
    %c0_i32_0 = arith.constant 0 : i32
    %c0_i32_1 = arith.constant 0 : i32
    return %c0_i32, %c0_i32_0 : i32, i32
  }
  func.func @transform_9(%arg0: i32) -> (i32, i32) {
    %c0_i32 = arith.constant 0 : i32
    %c0_i32_0 = arith.constant 0 : i32
    return %arg0, %c0_i32 : i32, i32
  }
}

</mosaic_0001>

<bundles_post_ra>
// kernel: actor_forward.1
= control target key start
LH: loop header
LB: loop body
LE: loop exit
PB: predicated region body
PF: predicated region fallthrough
CT: control target
= control target key end

     0   :  { %14 = vsyncpa [#allocation3], 0  ;;  %s1095_s0 = inlined_call_operand.hbm [shape: f32[8,32], index: 0, kind: input, shape index: {}]   ;;  %s1096_s1 = inlined_call_operand.hbm [shape: bf16[32,256], index: 1, kind: input, shape index: {}]   ;;  %s1097_s2 = inlined_call_operand.hbm [shape: f32[1,256], index: 2, kind: input, shape index: {}]   ;;  %s1098_s3 = inlined_call_operand.hbm [shape: bf16[256,256], index: 3, kind: input, shape index: {}]   ;;  %s1099_s4 = inlined_call_operand.vmem [shape: f32[1,256], index: 4, kind: input, shape index: {}]   ;;  %s1100_s5 = inlined_call_operand.hbm [shape: bf16[256,128], index: 5, kind: input, shape index: {}]   ;;  %s1101_s6 = inlined_call_operand.vmem [shape: f32[1,128], index: 6, kind: input, shape index: {}]   ;;  %s1102_s7 = inlined_call_operand.vmem [shape: f32[1,128], index: 7, kind: input, shape index: {}]   ;;  %s1103_s8 = inlined_call_operand.vmem [shape: f32[1,128], index: 8, kind: input, shape index: {}]   ;;  %s1104_s9 = inlined_call_operand.vmem [shape: bf16[8,128], index: 9, kind: output, shape index: {}]  }
   0x1   :  { %15 = vsyncpa [#allocation5], 0  ;;  %s32_s11 = sshll.u32 %s1096_s1, 4  ;;  %s33_s11 = int_to_ptr.hbm [resolvable:$true] %s32_s11 }
   0x2   :  { %16 = vsyncpa [#allocation8], 0  ;;  %s1004_s12 = smov [#allocation4]   ;;  %s56_s16 = sshll.u32 %s1098_s3, 4  ;;  %s57_s16 = int_to_ptr.hbm [resolvable:$true] %s56_s16 }
   0x3   :  { %s34_s13 = sshll.u32 %s1004_s12, 4  ;;  %s1005_s17 = smov 128   ;;  %s35_s13 = int_to_ptr.vmem [resolvable:$true] %s34_s13 }
   0x4   :  { %s1006_s18 = smov 8   ;;  %s1007_s19 = smov [#allocation7]  }
   0x5   :  { %40 = dma.hbm_to_vmem [thread:$0]  %s33_s11, 512, %s35_s13, [#allocation5], %s1005_s17, %s1005_s17, %s1006_s18  }
   0x6   :  { %s58_s20 = sshll.u32 %s1007_s19, 4  ;;  %s22_s23 = sshll.u32 %s1095_s0, 4  ;;  %s59_s20 = int_to_ptr.vmem [resolvable:$true] %s58_s20  ;;  %s23_s23 = int_to_ptr.hbm [resolvable:$true] %s22_s23 }
   0x7   :  { %64 = dma.hbm_to_vmem [thread:$0]  %s57_s16, 4096, %s59_s20, [#allocation8], %s1005_s17, %s1005_s17, %s1006_s18  }
   0x8   :  { %s46_s25 = sshll.u32 %s1097_s2, 4  ;;  %s1008_s26 = smov [#allocation2]   ;;  %s47_s25 = int_to_ptr.hbm [resolvable:$true] %s46_s25 }
   0x9   :  { %s24_s27 = sshll.u32 %s1008_s26, 4  ;;  %s1009_s3 = smov [#allocation6]   ;;  %s25_s27 = int_to_ptr.vmem [resolvable:$true] %s24_s27 }
   0xa   :  { %27 = dma.hbm_to_vmem [thread:$0]  %s23_s23, 128, %s25_s27, [#allocation3]  }
   0xb   :  { %s48_s28 = sshll.u32 %s1009_s3, 4  ;;  %s71_s10 = sshll.u32 %s1100_s5, 4  ;;  %s49_s28 = int_to_ptr.vmem [resolvable:$true] %s48_s28  ;;  %s72_s10 = int_to_ptr.hbm [resolvable:$true] %s71_s10 }
   0xc   :  { %51 = dma.hbm_to_vmem [thread:$0]  %s47_s25, 32, %s49_s28, [#allocation5]  }
   0xd   :  { %s1010_s0 = smov [#allocation9]   ;;  %s1011_s12 = smov 64  }
   0xe   :  { %s73_s11 = sshll.u32 %s1010_s0, 4  ;;  %s1012_s13 = smov 4   ;;  %s74_s11 = int_to_ptr.vmem [resolvable:$true] %s73_s11 }
   0xf   :  { %79 = dma.hbm_to_vmem [thread:$0]  %s72_s10, 2048, %s74_s11, [#allocation8], %s1011_s12, %s1011_s12, %s1012_s13  }
  0x10   :  { %998 = dma.done.wait [#allocation3], 128  }
  0x11   :  { %999 = vsyncadd [#allocation3], 4294967168 }
  0x12   :  { %1000 = dma.done.wait [#allocation5], 544  }
  0x13   :  { %1001 = vsyncadd [#allocation5], 4294966752 }
  0x14   :  { %1002 = dma.done.wait [#allocation8], 6144  }
  0x15   :  { %1003 = vsyncadd [#allocation8], 4294961152  ;;  %v614_v0 = vld [vmem:[#allocation4 + $0x10] sm:$0xf]  ;;  %v817_v1 = vld [vmem:[#allocation4 + $0x14] sm:$0xf0] }
  0x16   :  { %v816_v2 = vld [vmem:[#allocation4 + $0x14] sm:$0xf]  ;;  %v615_v3 = vor.u32 %v817_v1, %v614_v0  ;;  %v616_v4 = vld [vmem:[#allocation4 + $0x18] sm:$0xf0]  ;;  %v606_v5 = vld [vmem:[#allocation4] sm:$0xf] }
  0x17   :  { %v815_v6 = vld [vmem:[#allocation4 + $0x4] sm:$0xf0]  ;;  %v619_v7 = vor.u32 %v816_v2, %v616_v4  ;;  %v814_v8 = vld [vmem:[#allocation4 + $0x4] sm:$0xf]  ;;  %v608_v9 = vld [vmem:[#allocation4 + $0x8] sm:$0xf0] }
  0x18   :  { %v107_v10 = vld [vmem:[#allocation2] sm:$0xff]  ;;  %vm139_vm0 = vcmask 261120   ;;  %149 = vmatpush.bf16.msra.mxu0 %v615_v3  ;;  %v607_v11 = vor.u32 %v815_v6, %v606_v5  ;;  %v680_v12 = vld [vmem:[#allocation7 + $0x70] sm:$0xf]  ;;  %v611_v15 = vor.u32 %v814_v8, %v608_v9  ;;  %v672_v24 = vld [vmem:[#allocation7 + $0x60] sm:$0xf] }
  0x19   :  { %v833_v13 = vld [vmem:[#allocation7 + $0x74] sm:$0xf0]  ;;  %v744_v14 = vld [vmem:[#allocation7 + $0xf0] sm:$0xf]  ;;  %162 = vmatpush.bf16.msra.mxu1 %v619_v7  ;;  %v832_v18 = vld [vmem:[#allocation7 + $0x74] sm:$0xf]  ;;  %v108_v25 = vpack.c.bf16 %v107_v10, %v107_v10 }
  0x1a   :  { %v681_v16 = vor.u32 %v833_v13, %v680_v12  ;;  %v849_v17 = vld [vmem:[#allocation7 + $0xf4] sm:$0xf0]  ;;  %v682_v19 = vld [vmem:[#allocation7 + $0x78] sm:$0xf0]  ;;  %v848_v22 = vld [vmem:[#allocation7 + $0xf4] sm:$0xf] }
  0x1b   :  { %v745_v20 = vor.u32 %v849_v17, %v744_v14  ;;  %v685_v21 = vor.u32 %v832_v18, %v682_v19  ;;  %v746_v23 = vld [vmem:[#allocation7 + $0xf8] sm:$0xf0]  ;;  %v831_v27 = vld [vmem:[#allocation7 + $0x64] sm:$0xf0]  ;;  %v736_v28 = vld [vmem:[#allocation7 + $0xe0] sm:$0xf] }
  0x1c   :  { %371 = vmatpush.bf16.msra.mxu2 %v681_v16  ;;  %v749_v26 = vor.u32 %v848_v22, %v746_v23  ;;  %v847_v29 = vld [vmem:[#allocation7 + $0xe4] sm:$0xf0]  ;;  %150 = vmatpush.bf16.msra.mxu0 %v607_v11  ;;  %v673_v30 = vor.u32 %v831_v27, %v672_v24  ;;  %v830_v32 = vld [vmem:[#allocation7 + $0x64] sm:$0xf]  ;;  %v674_v33 = vld [vmem:[#allocation7 + $0x68] sm:$0xf0] }
  0x1d   :  { %384 = vmatpush.bf16.msra.mxu3 %v745_v20  ;;  %v737_v31 = vor.u32 %v847_v29, %v736_v28  ;;  %v846_v34 = vld [vmem:[#allocation7 + $0xe4] sm:$0xf]  ;;  %163 = vmatpush.bf16.msra.mxu1 %v611_v15  ;;  %v677_v35 = vor.u32 %v830_v32, %v674_v33  ;;  %v738_v36 = vld [vmem:[#allocation7 + $0xe8] sm:$0xf0]  ;;  %v664_v37 = vld [vmem:[#allocation7 + $0x50] sm:$0xf] }
  0x1e   :  { %v829_v38 = vld [vmem:[#allocation7 + $0x54] sm:$0xf0]  ;;  %v741_v39 = vor.u32 %v846_v34, %v738_v36  ;;  %v728_v40 = vld [vmem:[#allocation7 + $0xd0] sm:$0xf]  ;;  %v828_v42 = vld [vmem:[#allocation7 + $0x54] sm:$0xf] }
  0x1f   :  { %v845_v41 = vld [vmem:[#allocation7 + $0xd4] sm:$0xf0]  ;;  %620 = vmatmul.msk.bf16.vlgmr.msra.gmra.mxu0 %vm139_vm0, %v108_v25  ;;  %v665_v43 = vor.u32 %v829_v38, %v664_v37  ;;  %v666_v44 = vld [vmem:[#allocation7 + $0x58] sm:$0xf0]  ;;  %v844_v45 = vld [vmem:[#allocation7 + $0xd4] sm:$0xf] }
  0x20   :  { %397 = vmatpush.bf16.msrb.mxu0 %v685_v21  ;;  %372 = vmatpush.bf16.msra.mxu2 %v673_v30  ;;  %v730_v46 = vld [vmem:[#allocation7 + $0xd8] sm:$0xf0]  ;;  %v729_v47 = vor.u32 %v845_v41, %v728_v40  ;;  %v656_v48 = vld [vmem:[#allocation7 + $0x40] sm:$0xf]  ;;  %v827_v49 = vld [vmem:[#allocation7 + $0x44] sm:$0xf0]  ;;  %v669_v50 = vor.u32 %v828_v42, %v666_v44 }
  0x21   :  { %410 = vmatpush.bf16.msrb.mxu1 %v749_v26  ;;  %385 = vmatpush.bf16.msra.mxu3 %v737_v31  ;;  %v720_v51 = vld [vmem:[#allocation7 + $0xc0] sm:$0xf]  ;;  %v843_v52 = vld [vmem:[#allocation7 + $0xc4] sm:$0xf0]  ;;  %v733_v53 = vor.u32 %v844_v45, %v730_v46  ;;  %v826_v54 = vld [vmem:[#allocation7 + $0x44] sm:$0xf]  ;;  %v657_v56 = vor.u32 %v827_v49, %v656_v48 }
  0x22   :  { %621 = vmatmul.msk.bf16.vlgmr.msra.gmra.mxu1 %vm139_vm0, %v108_v25  ;;  %v658_v55 = vld [vmem:[#allocation7 + $0x48] sm:$0xf0]  ;;  %v842_v57 = vld [vmem:[#allocation7 + $0xc4] sm:$0xf]  ;;  %v721_v59 = vor.u32 %v843_v52, %v720_v51  ;;  %v648_v60 = vld [vmem:[#allocation7 + $0x30] sm:$0xf] }
  0x23   :  { %v722_v58 = vld [vmem:[#allocation7 + $0xc8] sm:$0xf0]  ;;  %v825_v61 = vld [vmem:[#allocation7 + $0x34] sm:$0xf0]  ;;  %v661_v62 = vor.u32 %v826_v54, %v658_v55  ;;  %v712_v63 = vld [vmem:[#allocation7 + $0xb0] sm:$0xf] }
  0x24   :  { %398 = vmatpush.bf16.msrb.mxu0 %v677_v35  ;;  %373 = vmatpush.bf16.msra.mxu2 %v665_v43  ;;  %v841_v0 = vld [vmem:[#allocation7 + $0xb4] sm:$0xf0]  ;;  %v725_v1 = vor.u32 %v842_v57, %v722_v58  ;;  %v824_v2 = vld [vmem:[#allocation7 + $0x34] sm:$0xf]  ;;  %v650_v3 = vld [vmem:[#allocation7 + $0x38] sm:$0xf0]  ;;  %v649_v4 = vor.u32 %v825_v61, %v648_v60 }
  0x25   :  { %411 = vmatpush.bf16.msrb.mxu1 %v741_v39  ;;  %386 = vmatpush.bf16.msra.mxu3 %v729_v47  ;;  %v840_v5 = vld [vmem:[#allocation7 + $0xb4] sm:$0xf]  ;;  %v714_v6 = vld [vmem:[#allocation7 + $0xb8] sm:$0xf0]  ;;  %v640_v7 = vld [vmem:[#allocation7 + $0x20] sm:$0xf]  ;;  %v713_v8 = vor.u32 %v841_v0, %v712_v63  ;;  %v653_v10 = vor.u32 %v824_v2, %v650_v3 }
  0x26   :  { %v823_v9 = vld [vmem:[#allocation7 + $0x24] sm:$0xf0]  ;;  %v704_v11 = vld [vmem:[#allocation7 + $0xa0] sm:$0xf]  ;;  %v717_v13 = vor.u32 %v840_v5, %v714_v6  ;;  %v822_v14 = vld [vmem:[#allocation7 + $0x24] sm:$0xf] }
  0x27   :  { %v839_v12 = vld [vmem:[#allocation7 + $0xa4] sm:$0xf0]  ;;  %v642_v15 = vld [vmem:[#allocation7 + $0x28] sm:$0xf0]  ;;  %v641_v16 = vor.u32 %v823_v9, %v640_v7  ;;  %v838_v17 = vld [vmem:[#allocation7 + $0xa4] sm:$0xf] }
  0x28   :  { %399 = vmatpush.bf16.msrb.mxu0 %v669_v50  ;;  %374 = vmatpush.bf16.msra.mxu2 %v657_v56  ;;  %v706_v18 = vld [vmem:[#allocation7 + $0xa8] sm:$0xf0]  ;;  %v705_v19 = vor.u32 %v839_v12, %v704_v11  ;;  %v645_v20 = vor.u32 %v822_v14, %v642_v15  ;;  %v632_v22 = vld [vmem:[#allocation7 + $0x10] sm:$0xf]  ;;  %v821_v23 = vld [vmem:[#allocation7 + $0x14] sm:$0xf0] }
  0x29   :  { %412 = vmatpush.bf16.msrb.mxu1 %v733_v53  ;;  %387 = vmatpush.bf16.msra.mxu3 %v721_v59  ;;  %v709_v21 = vor.u32 %v838_v17, %v706_v18  ;;  %v696_v24 = vld [vmem:[#allocation7 + $0x90] sm:$0xf]  ;;  %v633_v25 = vor.u32 %v821_v23, %v632_v22  ;;  %v837_v26 = vld [vmem:[#allocation7 + $0x94] sm:$0xf0]  ;;  %v820_v27 = vld [vmem:[#allocation7 + $0x14] sm:$0xf] }
  0x2a   :  { %v634_v28 = vld [vmem:[#allocation7 + $0x18] sm:$0xf0]  ;;  %v697_v29 = vor.u32 %v837_v26, %v696_v24  ;;  %v836_v31 = vld [vmem:[#allocation7 + $0x94] sm:$0xf]  ;;  %v624_v34 = vld [vmem:[#allocation7] sm:$0xf] }
  0x2b   :  { %v637_v30 = vor.u32 %v820_v27, %v634_v28  ;;  %v698_v32 = vld [vmem:[#allocation7 + $0x98] sm:$0xf0]  ;;  %v819_v35 = vld [vmem:[#allocation7 + $0x4] sm:$0xf0]  ;;  %v688_v36 = vld [vmem:[#allocation7 + $0x80] sm:$0xf] }
  0x2c   :  { %400 = vmatpush.bf16.msrb.mxu0 %v661_v62  ;;  %375 = vmatpush.bf16.msra.mxu2 %v649_v4  ;;  %v701_v33 = vor.u32 %v836_v31, %v698_v32  ;;  %v625_v37 = vor.u32 %v819_v35, %v624_v34  ;;  %v835_v38 = vld [vmem:[#allocation7 + $0x84] sm:$0xf0]  ;;  %v818_v39 = vld [vmem:[#allocation7 + $0x4] sm:$0xf]  ;;  %v626_v40 = vld [vmem:[#allocation7 + $0x8] sm:$0xf0] }
  0x2d   :  { %413 = vmatpush.bf16.msrb.mxu1 %v725_v1  ;;  %388 = vmatpush.bf16.msra.mxu3 %v713_v8  ;;  %v689_v41 = vor.u32 %v835_v38, %v688_v36  ;;  %v629_v42 = vor.u32 %v818_v39, %v626_v40  ;;  %v834_v43 = vld [vmem:[#allocation7 + $0x84] sm:$0xf]  ;;  %v690_v44 = vld [vmem:[#allocation7 + $0x88] sm:$0xf0]  ;;  %v865_v46 = vld [vmem:[#allocation9 + $0x78] sm:$0xff] }
  0x2e   :  { %v693_v45 = vor.u32 %v834_v43, %v690_v44  ;;  %v857_v47 = vld [vmem:[#allocation9 + $0x38] sm:$0xff]  ;;  %v864_v48 = vld [vmem:[#allocation9 + $0x70] sm:$0xff]  ;;  %v863_v50 = vld [vmem:[#allocation9 + $0x68] sm:$0xff] }
  0x2f   :  { %v856_v49 = vld [vmem:[#allocation9 + $0x30] sm:$0xff]  ;;  %v855_v51 = vld [vmem:[#allocation9 + $0x28] sm:$0xff]  ;;  %v862_v52 = vld [vmem:[#allocation9 + $0x60] sm:$0xff] }
  0x30   :  { %401 = vmatpush.bf16.msrb.mxu0 %v653_v10  ;;  %376 = vmatpush.bf16.msra.mxu2 %v641_v16  ;;  %v854_v53 = vld [vmem:[#allocation9 + $0x20] sm:$0xff]  ;;  %v861_v54 = vld [vmem:[#allocation9 + $0x58] sm:$0xff]  ;;  %v860_v56 = vld [vmem:[#allocation9 + $0x50] sm:$0xff] }
  0x31   :  { %414 = vmatpush.bf16.msrb.mxu1 %v717_v13  ;;  %389 = vmatpush.bf16.msra.mxu3 %v705_v19  ;;  %v113_v55 = vld [vmem:[#allocation6] sm:$0x3]  ;;  %v859_v6 = vld [vmem:[#allocation9 + $0x48] sm:$0xff]  ;;  %v852_v7 = vld [vmem:[#allocation9 + $0x10] sm:$0xff] }
  0x32   :  { %v115_v57 = vperm.slane %v113_v55, 0  ;;  %v116_v58 = vperm.slane %v113_v55, 1  ;;  %v853_v5 = vld [vmem:[#allocation9 + $0x18] sm:$0xff]  ;;  %v858_v8 = vld [vmem:[#allocation9 + $0x40] sm:$0xff]  ;;  %v851_v9 = vld [vmem:[#allocation9 + $0x8] sm:$0xff] }
  0x33   :  { %v850_v10 = vld [vmem:[#allocation9] sm:$0xff]  ;;  %v205_v11 = vld [vmem:[%s1099_s4] sm:$0x3] }
  0x34   :  { %402 = vmatpush.bf16.msrb.mxu0 %v645_v20  ;;  %377 = vmatpush.bf16.msra.mxu2 %v633_v25  ;;  %v208_v12 = vperm.slane %v205_v11, 1  ;;  %v207_v17 = vperm.slane %v205_v11, 0  ;;  %v875_v31 = vld [vmem:[%s1101_s6] ss:$0 sm:$0xff] }
  0x35   :  { %415 = vmatpush.bf16.msrb.mxu1 %v709_v21  ;;  %390 = vmatpush.bf16.msra.mxu3 %v697_v29  ;;  %v876_v34 = vld [vmem:[%s1102_s7] ss:$0 sm:$0xff] }
  0x38   :  { %403 = vmatpush.bf16.msrb.mxu0 %v637_v30  ;;  %378 = vmatpush.bf16.msra.mxu2 %v625_v37  ;;  %v877_v37 = vld [vmem:[%s1103_s8] ss:$0 sm:$0xff] }
  0x39   :  { %416 = vmatpush.bf16.msrb.mxu1 %v701_v33  ;;  %391 = vmatpush.bf16.msra.mxu3 %v689_v41 }
  0x3c   :  { %404 = vmatpush.bf16.msrb.mxu0 %v629_v42  ;;  %559 = vmatpush.bf16.msrb.mxu2 %v857_v47 }
  0x3d   :  { %417 = vmatpush.bf16.msrb.mxu1 %v693_v45  ;;  %572 = vmatpush.bf16.msrb.mxu3 %v865_v46 }
  0x40   :  { %560 = vmatpush.bf16.msrb.mxu2 %v856_v49 }
  0x41   :  { %573 = vmatpush.bf16.msrb.mxu3 %v864_v48 }
  0x44   :  { %561 = vmatpush.bf16.msrb.mxu2 %v855_v51 }
  0x45   :  { %574 = vmatpush.bf16.msrb.mxu3 %v863_v50 }
  0x48   :  { %562 = vmatpush.bf16.msrb.mxu2 %v854_v53 }
  0x49   :  { %575 = vmatpush.bf16.msrb.mxu3 %v862_v52 }
  0x4c   :  { %563 = vmatpush.bf16.msrb.mxu2 %v853_v5 }
  0x4d   :  { %576 = vmatpush.bf16.msrb.mxu3 %v861_v54 }
  0x50   :  { %564 = vmatpush.bf16.msrb.mxu2 %v852_v7 }
  0x51   :  { %577 = vmatpush.bf16.msrb.mxu3 %v860_v56 }
  0x54   :  { %565 = vmatpush.bf16.msrb.mxu2 %v851_v9 }
  0x55   :  { %578 = vmatpush.bf16.msrb.mxu3 %v859_v6 }
  0x58   :  { %566 = vmatpush.bf16.msrb.mxu2 %v850_v10 }
  0x59   :  { %579 = vmatpush.bf16.msrb.mxu3 %v858_v8 }
  0x9c   :  { %v152_v59 = vpop.f32.mrf.mxu0 }
  0x9d   :  { %v153_v60 = vadd.f32 %v152_v59, %v115_v57 }
  0x9f   :  { %v165_v61 = vpop.f32.mrf.mxu1  ;;  %v169_v63 = vmax.f32 %v153_v60, 0.0 }
  0xa0   :  { %v166_v62 = vadd.f32 %v165_v61, %v116_v58 }
  0xa1   :  { %v171_v1 = vpack.c.bf16 %v169_v63, %v169_v63 }
  0xa2   :  { %v170_v0 = vmax.f32 %v166_v62, 0.0 }
  0xa3   :  { %379 = vmatmul.bf16.vlgmr.msra.gmra.mxu2 %v171_v1  ;;  %405 = vmatmul.bf16.vlgmr.msrb.gmra.mxu0 %v171_v1 }
  0xa4   :  { %v172_v2 = vpack.c.bf16 %v170_v0, %v170_v0  ;;  %v154_v3 = vpop.f32.mrf.mxu0 }
  0xa6   :  { %392 = vmatmul.bf16.vlgmr.msra.gmra.mxu3 %v172_v2  ;;  %418 = vmatmul.bf16.vlgmr.msrb.gmra.mxu1 %v172_v2 }
  0xa7   :  { %v167_v4 = vpop.f32.mrf.mxu1 }
 0x120   :  { %v406_v13 = vpop.f32.mrf.mxu0 }
 0x121   :  { %v407_v14 = vadd.f32 %v406_v13, %v208_v12 }
 0x123   :  { %v419_v15 = vpop.f32.mrf.mxu1 }
 0x124   :  { %v420_v16 = vadd.f32 %v419_v15, %v407_v14 }
 0x126   :  { %v424_v18 = vmax.f32 %v420_v16, 0.0  ;;  %v380_v19 = vpop.f32.mrf.mxu2 }
 0x127   :  { %v381_v21 = vadd.f32 %v380_v19, %v207_v17 }
 0x128   :  { %v426_v20 = vpack.c.bf16 %v424_v18, %v424_v18  ;;  %v408_v23 = vpop.f32.mrf.mxu0 }
 0x129   :  { %v393_v22 = vpop.f32.mrf.mxu3 }
 0x12a   :  { %v394_v24 = vadd.f32 %v393_v22, %v381_v21  ;;  %580 = vmatmul.bf16.vlgmr.msrb.gmra.mxu3 %v426_v20 }
 0x12b   :  { %v421_v25 = vpop.f32.mrf.mxu1 }
 0x12c   :  { %v423_v26 = vmax.f32 %v394_v24, 0.0 }
 0x12e   :  { %v425_v27 = vpack.c.bf16 %v423_v26, %v423_v26  ;;  %v382_v28 = vpop.f32.mrf.mxu2 }
 0x130   :  { %567 = vmatmul.bf16.vlgmr.msrb.gmra.mxu2 %v425_v27 }
 0x131   :  { %v395_v29 = vpop.f32.mrf.mxu3 }
 0x1ad   :  { %v581_v30 = vpop.f32.mrf.mxu3 }
 0x1b3   :  { %v568_v32 = vpop.f32.mrf.mxu2 }
 0x1b4   :  { %v569_v33 = vadd.f32 %v875_v31, %v568_v32 }
 0x1b5   :  { %v583_v35 = vpop.f32.mrf.mxu3 }
 0x1b6   :  { %v582_v36 = vadd.f32 %v581_v30, %v569_v33 }
 0x1b8   :  { %v589_v38 = vmax.f32 %v582_v36, %v876_v34 }
 0x1ba   :  { %v594_v39 = vmin.f32 %v589_v38, %v877_v37 }
 0x1bb   :  { %v570_v40 = vpop.f32.mrf.mxu2 }
 0x1bc   :  { %v595_v41 = vpack.c.bf16 %v594_v39, %v594_v39 }
 0x1be   :  { %596 = vst [vmem:[%s1104_s9] sm:$0xf] %v595_v41 }
 0x1bf   :  { %601 = vsyncpa [#allocation3], 1 }
 0x1c0   :  { %602 = vsyncpa [#allocation5], 1 }
 0x1c1   :  { %603 = vsyncpa [#allocation8], 1 }

</bundles_post_ra>
